<compile_context>
chip_gen: v7x
topology: tpu7x:2x2x1
jax: 0.10.0
libtpu: 0.0.40
codegen_flags: <defaults>
</compile_context>

<pallas_src>
import numpy as np

import jax
import jax.numpy as jnp
from jax.experimental import pallas as pl
from jax.experimental.pallas import tpu as pltpu


def _round_up(x, m):
    return ((x + m - 1) // m) * m


def _topdown_level_kernel(hc0_ref, onehot_ref, whh_ref, gx_ref, h_out_ref, hc_ref):
    """One tree depth (wavefront) per grid step; hc_ref carries [h | c]."""
    wmax, two_hp = hc_ref.shape
    hp = two_hp // 2
    l = pl.program_id(0)

    @pl.when(l == 0)
    def _():
        # Root level: h0 = tanh(Linear(x_root)) and c0 = provided state were
        # hoisted to the wrapper and arrive as one (1, 2*Hp) row.  The root is
        # the unique depth-0 node (asserted host-side), so broadcasting across
        # the padded Wmax slots is harmless.
        hc_ref[...] = jnp.broadcast_to(hc0_ref[...], (wmax, two_hp))
        h_out_ref[0] = jnp.broadcast_to(hc0_ref[:, :hp], (wmax, hp))

    @pl.when(l > 0)
    def _():
        # Fused parent (h, c) gather: ONE one-hot matmul on the MXU over the
        # concatenated carry.  Kept f32: (Wmax x Wmax x 2Hp) is negligible
        # even on v5e and the exact-copy gather keeps pad lanes at 0.
        par = jnp.dot(onehot_ref[0], hc_ref[...],
                      preferred_element_type=jnp.float32)          # (Wmax, 2*Hp)
        c_par = par[:, hp:]

        # Fused recurrent term for all four gates in ONE MXU op (bf16 operands,
        # f32 accumulation); gate order i|f|o|g.  gx already holds
        # x @ W_ih^T + b_ih + b_hh in the same layout.
        rec = jnp.dot(par[:, :hp].astype(jnp.bfloat16), whh_ref[...],
                      preferred_element_type=jnp.float32)          # (Wmax, 4*Hp)
        gates = gx_ref[0] + rec

        # One sigmoid over the contiguous i|f|o slab, one tanh for g.
        ifo = jax.nn.sigmoid(gates[:, :3 * hp])
        g_g = jnp.tanh(gates[:, 3 * hp:])

        # Pad-lane invariant: gx / whh / carry pad lanes are 0, so gate pads
        # are sigmoid(0)=0.5 / tanh(0)=0 and the c, h pad lanes stay exactly 0.
        c = ifo[:, hp:2 * hp] * c_par + ifo[:, :hp] * g_g
        h = ifo[:, 2 * hp:3 * hp] * jnp.tanh(c)

        h_out_ref[0] = h
        hc_ref[:, :hp] = h
        hc_ref[:, hp:] = c


def topdown_tree_lstm(node_idx, parent_pos, inputs, state,
                      w_root, b_root, w_ih, b_ih, w_hh, b_hh):
    """Returns (root_topdown_state, root_topdown, hiddens) like the torch module.

    node_idx[n]   : row of `inputs` used by tree node n (topological order, 0 = root)
    parent_pos[n] : position (< n) of node n's parent.
    """
    node_idx_np = np.asarray(node_idx, dtype=np.int32)
    parent_np = np.asarray(parent_pos, dtype=np.int32)
    num_nodes = int(node_idx_np.shape[0])
    N, in_dim = inputs.shape
    H = w_root.shape[0]

    # The module feeds inputs[idx] straight into nn.LSTMCell(mem_dim, mem_dim),
    # so it is only consistent when in_dim == mem_dim.
    assert in_dim == H, "TopDownTreeLSTM requires in_dim == mem_dim"
    assert w_ih.shape == (4 * H, H) and w_hh.shape == (4 * H, H)
    assert num_nodes >= 1
    assert np.all((node_idx_np >= 0) & (node_idx_np < N)), "node_idx out of range"
    assert len(np.unique(node_idx_np)) == num_nodes, \
        "duplicate node_idx rows would diverge from sequential-overwrite semantics"
    assert np.all(parent_np >= 0)
    if num_nodes > 1:
        assert np.all(parent_np[1:] < np.arange(1, num_nodes)), "parent must precede child"

    if state is None:
        state = jnp.zeros((1, H), jnp.float32)
    state = jnp.asarray(state, jnp.float32).reshape(1, H)

    # ---- host side: flatten the recursion into levels (wavefronts) ----
    depth = np.zeros(num_nodes, dtype=np.int32)
    for n in range(1, num_nodes):
        depth[n] = depth[parent_np[n]] + 1
    num_levels = int(depth.max()) + 1
    counts = np.bincount(depth, minlength=num_levels)
    assert counts[0] == 1, "root must be the unique depth-0 node"
    # 16-sublane alignment so the bf16 LHS of the fused gate matmul is a full
    # packed (16, 128) tile.
    wmax = _round_up(int(counts.max()), 16)

    slot = np.zeros(num_nodes, dtype=np.int32)        # slot of each node within its level
    seen = np.zeros(num_levels, dtype=np.int32)
    for n in range(num_nodes):
        slot[n] = seen[depth[n]]
        seen[depth[n]] += 1
    flat_pos = (depth.astype(np.int32) * wmax + slot).astype(np.int32)

    # Static one-hot parent-gather matrices, precomputed from the static tree.
    # Pad rows are all-zero: their gather result is 0 and nothing reads them.
    onehot_np = np.zeros((num_levels, wmax, wmax), dtype=np.float32)
    for n in range(1, num_nodes):
        onehot_np[depth[n], slot[n], slot[parent_np[n]]] = 1.0
    onehot = jnp.asarray(onehot_np)

    # ---- lane padding: hidden dim rounded up to a full 128-lane vreg ----
    hp_dim = _round_up(H, 128)
    # Kernel gate order i|f|o|g (torch LSTMCell rows are i, f, g, o).
    GATE_ORDER = (0, 1, 3, 2)

    w_hh_f32 = jnp.asarray(w_hh, jnp.float32)
    whh_all = jnp.concatenate(
        [jnp.pad(w_hh_f32[g * H:(g + 1) * H, :].T,
                 ((0, hp_dim - H), (0, hp_dim - H))) for g in GATE_ORDER],
        axis=1).astype(jnp.bfloat16)                                   # (Hp, 4*Hp)

    # ---- hoisted input projection: one batched XLA matmul for ALL nodes,
    #      emitted directly in padded, gate-concatenated (i|f|o|g) layout ----
    w_ih_f32 = jnp.asarray(w_ih, jnp.float32)
    b_sum = jnp.asarray(b_ih, jnp.float32) + jnp.asarray(b_hh, jnp.float32)
    w_ih_big = jnp.concatenate(
        [jnp.pad(w_ih_f32[g * H:(g + 1) * H, :].T, ((0, 0), (0, hp_dim - H)))
         for g in GATE_ORDER], axis=1)                                 # (D, 4*Hp)
    b_big = jnp.concatenate(
        [jnp.pad(b_sum[g * H:(g + 1) * H], (0, hp_dim - H))
         for g in GATE_ORDER])[None, :]                                # (1, 4*Hp)

    x_nodes = jnp.asarray(inputs, jnp.float32)[node_idx_np]            # (num_nodes, D)
    x_padded = jnp.zeros((num_levels * wmax, in_dim), jnp.float32
                         ).at[flat_pos].set(x_nodes)
    gx = (x_padded @ w_ih_big + b_big).reshape(num_levels, wmax, 4 * hp_dim)

    # ---- hoisted root projection + initial cell state -> one (1, 2*Hp) row ----
    x_root = jnp.asarray(inputs, jnp.float32)[node_idx_np[0]][None, :]
    h0 = jnp.tanh(x_root @ jnp.asarray(w_root, jnp.float32).T
                  + jnp.asarray(b_root, jnp.float32)[None, :])          # (1, H)
    hc0 = jnp.concatenate(
        [jnp.pad(h0, ((0, 0), (0, hp_dim - H))),
         jnp.pad(state, ((0, 0), (0, hp_dim - H)))], axis=1)            # (1, 2*Hp)

    grid_spec = pltpu.PrefetchScalarGridSpec(
        num_scalar_prefetch=0,
        grid=(num_levels,),
        in_specs=[
            pl.BlockSpec((1, 2 * hp_dim), lambda l: (0, 0)),            # [h0|c0], resident
            pl.BlockSpec((1, wmax, wmax), lambda l: (l, 0, 0)),         # one-hot per level
            pl.BlockSpec((hp_dim, 4 * hp_dim), lambda l: (0, 0)),       # fused W_hh, resident
            pl.BlockSpec((1, wmax, 4 * hp_dim), lambda l: (l, 0, 0)),   # gx per level
        ],
        out_specs=pl.BlockSpec((1, wmax, hp_dim), lambda l: (l, 0, 0)), # h per level
        scratch_shapes=[pltpu.VMEM((wmax, 2 * hp_dim), jnp.float32)],   # [h | c] carry
    )

    h_out = pl.pallas_call(
        _topdown_level_kernel,
        grid_spec=grid_spec,
        out_shape=jax.ShapeDtypeStruct((num_levels, wmax, hp_dim), jnp.float32),
        compiler_params=pltpu.CompilerParams(dimension_semantics=("arbitrary",)),
    )(hc0, onehot, whh_all, gx)

    # ---- XLA-side epilogue: strip padding, scatter hiddens by token row ----
    h_flat = h_out.reshape(num_levels * wmax, hp_dim)[:, :H]
    root_h = h_flat[0:1]
    hiddens = jnp.zeros((N, H), jnp.float32).at[
        jnp.asarray(node_idx_np)].set(h_flat[jnp.asarray(flat_pos)])
    root_c = state                                    # tree.topdown_state of the root
    return root_c, root_h, hiddens


def topdown_tree_lstm_ref(node_idx, parent_pos, inputs, state,
                          w_root, b_root, w_ih, b_ih, w_hh, b_hh):
    """Pure-JAX reference mirroring the torch recursion, for validation."""
    N, _ = inputs.shape
    H = w_root.shape[0]
    num_nodes = len(node_idx)
    h_all = [None] * num_nodes
    c_all = [None] * num_nodes
    hiddens = jnp.zeros((N, H), jnp.float32)

    x0 = inputs[int(node_idx[0])][None, :]
    h_all[0] = jnp.tanh(x0 @ w_root.T + b_root)
    c_all[0] = state
    hiddens = hiddens.at[int(node_idx[0])].set(h_all[0][0])

    for n in range(1, num_nodes):
        x = inputs[int(node_idx[n])][None, :]
        p = int(parent_pos[n])
        gates = x @ w_ih.T + b_ih + h_all[p] @ w_hh.T + b_hh
        i_g, f_g, g_g, o_g = jnp.split(gates, 4, axis=1)
        i_g = jax.nn.sigmoid(i_g)
        f_g = jax.nn.sigmoid(f_g)
        g_g = jnp.tanh(g_g)
        o_g = jax.nn.sigmoid(o_g)
        c = f_g * c_all[p] + i_g * g_g
        h = o_g * jnp.tanh(c)
        h_all[n], c_all[n] = h, c
        hiddens = hiddens.at[int(node_idx[n])].set(h[0])
    return c_all[0], h_all[0], hiddens


if __name__ == "__main__":
    in_dim = 32
    mem_dim = 32
    N = 8                     # number of tokens == number of tree nodes

    key = jax.random.PRNGKey(0)
    ks = jax.random.split(key, 8)
    inputs = jax.random.normal(ks[0], (N, in_dim), dtype=jnp.float32)
    state = 0.1 * jax.random.normal(ks[1], (1, mem_dim), dtype=jnp.float32)

    w_root = 0.1 * jax.random.normal(ks[2], (mem_dim, in_dim), dtype=jnp.float32)
    b_root = 0.1 * jax.random.normal(ks[3], (mem_dim,), dtype=jnp.float32)
    w_ih = 0.1 * jax.random.normal(ks[4], (4 * mem_dim, mem_dim), dtype=jnp.float32)
    b_ih = 0.1 * jax.random.normal(ks[5], (4 * mem_dim,), dtype=jnp.float32)
    w_hh = 0.1 * jax.random.normal(ks[6], (4 * mem_dim, mem_dim), dtype=jnp.float32)
    b_hh = 0.1 * jax.random.normal(ks[7], (4 * mem_dim,), dtype=jnp.float32)

    # Tree flattened in topological (parent-before-child) order; node 0 = root.
    #   positions:   0  1  2  3  4  5  6  7
    #   parent pos:  -  0  0  1  1  2  4  3
    node_idx = np.array([3, 0, 5, 1, 7, 2, 6, 4], dtype=np.int32)    # row of `inputs` per node
    parent_pos = np.array([0, 0, 0, 1, 1, 2, 4, 3], dtype=np.int32)

    root_c, root_h, hiddens = topdown_tree_lstm(
        node_idx, parent_pos, inputs, state,
        w_root, b_root, w_ih, b_ih, w_hh, b_hh)
    jax.block_until_ready((root_c, root_h, hiddens))

    # Validate against the pure-JAX reference.
    ref_c, ref_h, ref_hid = topdown_tree_lstm_ref(
        node_idx, parent_pos, inputs, state,
        w_root, b_root, w_ih, b_ih, w_hh, b_hh)
    assert jnp.allclose(root_c, ref_c, atol=1e-2, rtol=1e-2)
    assert jnp.allclose(root_h, ref_h, atol=1e-2, rtol=1e-2)
    assert jnp.allclose(hiddens, ref_hid, atol=1e-2, rtol=1e-2)

    # TODO(synk): `tree.topdown_hidden_traversal` is not defined in the source;
    # assumed it scatters each node's topdown hidden into row `node.idx` of a
    # zero-initialized (num_tokens, mem_dim) matrix.
    print("KERNEL_OK")
</pallas_src>

<mosaic_0001>
module attributes {stable_mosaic.version = 11 : i64} {
  func.func @_topdown_level_kernel(%arg0: i32, %arg1: memref<1x256xf32, #tpu.memory_space<vmem>>, %arg2: memref<1x16x16xf32, #tpu.memory_space<vmem>>, %arg3: memref<128x512xbf16, #tpu.memory_space<vmem>>, %arg4: memref<1x16x512xf32, #tpu.memory_space<vmem>>, %arg5: memref<1x16x128xf32, #tpu.memory_space<vmem>>, %arg6: memref<16x256xf32, #tpu.memory_space<vmem>>) attributes {dimension_semantics = [#tpu.dimension_semantics<arbitrary>], iteration_bounds = array<i64: 4>, scalar_prefetch = 0 : i64, scratch_operands = 1 : i64, tpu.core_type = #tpu.core_type<tc>, window_params = [{pipeline_mode = #tpu.pipeline_mode<synchronous>, transform_indices = @transform_0, window_bounds = array<i64: 1, 256>}, {transform_indices = @transform_1, window_bounds = array<i64: 1, 16, 16>}, {pipeline_mode = #tpu.pipeline_mode<synchronous>, transform_indices = @transform_2, window_bounds = array<i64: 128, 512>}, {transform_indices = @transform_3, window_bounds = array<i64: 1, 16, 512>}, {transform_indices = @transform_4, window_bounds = array<i64: 1, 16, 128>}]} {
    %c0_i32 = arith.constant 0 : i32
    %0 = arith.cmpi eq, %arg0, %c0_i32 : i32
    %1 = arith.extui %0 : i1 to i32
    %c0_i32_0 = arith.constant 0 : i32
    %2 = arith.cmpi ne, %1, %c0_i32_0 : i32
    scf.if %2 {
      %c0 = arith.constant 0 : index
      %c0_3 = arith.constant 0 : index
      %6 = vector.load %arg1[%c0, %c0_3] : memref<1x256xf32, #tpu.memory_space<vmem>>, vector<1x256xf32>
      %7 = vector.shape_cast %6 : vector<1x256xf32> to vector<1x256xf32>
      %8 = vector.broadcast %7 : vector<1x256xf32> to vector<16x256xf32>
      %c0_4 = arith.constant 0 : index
      %c0_5 = arith.constant 0 : index
      %9 = vector.load %arg6[%c0_4, %c0_5] : memref<16x256xf32, #tpu.memory_space<vmem>>, vector<16x256xf32>
      tpu.vector_store %arg6[%c0_4, %c0_5], %8 {strides = array<i32>} : memref<16x256xf32, #tpu.memory_space<vmem>>, vector<16x256xf32>,
      %c0_6 = arith.constant 0 : index
      %c0_7 = arith.constant 0 : index
      %10 = vector.load %arg1[%c0_6, %c0_7] : memref<1x256xf32, #tpu.memory_space<vmem>>, vector<1x128xf32>
      %11 = vector.shape_cast %10 : vector<1x128xf32> to vector<1x128xf32>
      %12 = vector.broadcast %11 : vector<1x128xf32> to vector<16x128xf32>
      %c0_8 = arith.constant 0 : index
      %c0_9 = arith.constant 0 : index
      %c0_10 = arith.constant 0 : index
      %13 = vector.load %arg5[%c0_8, %c0_9, %c0_10] : memref<1x16x128xf32, #tpu.memory_space<vmem>>, vector<1x16x128xf32>
      %14 = vector.shape_cast %13 : vector<1x16x128xf32> to vector<16x128xf32>
      %15 = vector.shape_cast %12 : vector<16x128xf32> to vector<1x16x128xf32>
      tpu.vector_store %arg5[%c0_8, %c0_9, %c0_10], %15 {strides = array<i32>} : memref<1x16x128xf32, #tpu.memory_space<vmem>>, vector<1x16x128xf32>,
    } else {
    }
    %c0_i32_1 = arith.constant 0 : i32
    %3 = arith.cmpi sgt, %arg0, %c0_i32_1 : i32
    %4 = arith.extui %3 : i1 to i32
    %c0_i32_2 = arith.constant 0 : i32
    %5 = arith.cmpi ne, %4, %c0_i32_2 : i32
    scf.if %5 {
      %c0 = arith.constant 0 : index
      %c0_3 = arith.constant 0 : index
      %c0_4 = arith.constant 0 : index
      %6 = vector.load %arg2[%c0, %c0_3, %c0_4] : memref<1x16x16xf32, #tpu.memory_space<vmem>>, vector<1x16x16xf32>
      %7 = vector.shape_cast %6 : vector<1x16x16xf32> to vector<16x16xf32>
      %c0_5 = arith.constant 0 : index
      %c0_6 = arith.constant 0 : index
      %8 = vector.load %arg6[%c0_5, %c0_6] : memref<16x256xf32, #tpu.memory_space<vmem>>, vector<16x256xf32>
      %cst = arith.constant dense<0.000000e+00> : vector<16x256xf32>
      %9 = tpu.matmul %7, %8, %cst {dimension_numbers = #tpu.dot_dimension_numbers<[1], [0], [0], [1], [0, 0, 1, 1], [], []>} : vector<16x16xf32>, vector<16x256xf32>, vector<16x256xf32> -> vector<16x256xf32>
      %10 = vector.extract_strided_slice %9 {offsets = [0, 128], sizes = [16, 128], strides = [1, 1]} : vector<16x256xf32> to vector<16x128xf32>
      %11 = vector.extract_strided_slice %9 {offsets = [0, 0], sizes = [16, 128], strides = [1, 1]} : vector<16x256xf32> to vector<16x128xf32>
      %12 = arith.truncf %11 : vector<16x128xf32> to vector<16x128xbf16>
      %c0_7 = arith.constant 0 : index
      %c0_8 = arith.constant 0 : index
      %13 = vector.load %arg3[%c0_7, %c0_8] : memref<128x512xbf16, #tpu.memory_space<vmem>>, vector<128x512xbf16>
      %cst_9 = arith.constant dense<0.000000e+00> : vector<16x512xf32>
      %14 = tpu.matmul %12, %13, %cst_9 {dimension_numbers = #tpu.dot_dimension_numbers<[1], [0], [0], [1], [0, 0, 1, 1], [], []>} : vector<16x128xbf16>, vector<128x512xbf16>, vector<16x512xf32> -> vector<16x512xf32>
      %c0_10 = arith.constant 0 : index
      %c0_11 = arith.constant 0 : index
      %c0_12 = arith.constant 0 : index
      %15 = vector.load %arg4[%c0_10, %c0_11, %c0_12] : memref<1x16x512xf32, #tpu.memory_space<vmem>>, vector<1x16x512xf32>
      %16 = vector.shape_cast %15 : vector<1x16x512xf32> to vector<16x512xf32>
      %17 = arith.addf %16, %14 : vector<16x512xf32>
      %18 = vector.extract_strided_slice %17 {offsets = [0, 0], sizes = [16, 384], strides = [1, 1]} : vector<16x512xf32> to vector<16x384xf32>
      %19 = arith.negf %18 : vector<16x384xf32>
      %20 = math.exp %19 : vector<16x384xf32>
      %cst_13 = arith.constant 1.000000e+00 : f32
      %21 = vector.broadcast %cst_13 : f32 to vector<16x384xf32>
      %22 = arith.addf %21, %20 : vector<16x384xf32>
      %23 = arith.divf %21, %22 : vector<16x384xf32>
      %24 = vector.extract_strided_slice %17 {offsets = [0, 384], sizes = [16, 128], strides = [1, 1]} : vector<16x512xf32> to vector<16x128xf32>
      %25 = math.tanh %24 : vector<16x128xf32>
      %26 = vector.extract_strided_slice %23 {offsets = [0, 128], sizes = [16, 128], strides = [1, 1]} : vector<16x384xf32> to vector<16x128xf32>
      %27 = arith.mulf %26, %10 : vector<16x128xf32>
      %28 = vector.extract_strided_slice %23 {offsets = [0, 0], sizes = [16, 128], strides = [1, 1]} : vector<16x384xf32> to vector<16x128xf32>
      %29 = arith.mulf %28, %25 : vector<16x128xf32>
      %30 = arith.addf %27, %29 : vector<16x128xf32>
      %31 = vector.extract_strided_slice %23 {offsets = [0, 256], sizes = [16, 128], strides = [1, 1]} : vector<16x384xf32> to vector<16x128xf32>
      %32 = math.tanh %30 : vector<16x128xf32>
      %33 = arith.mulf %31, %32 : vector<16x128xf32>
      %c0_14 = arith.constant 0 : index
      %c0_15 = arith.constant 0 : index
      %c0_16 = arith.constant 0 : index
      %34 = vector.load %arg5[%c0_14, %c0_15, %c0_16] : memref<1x16x128xf32, #tpu.memory_space<vmem>>, vector<1x16x128xf32>
      %35 = vector.shape_cast %34 : vector<1x16x128xf32> to vector<16x128xf32>
      %36 = vector.shape_cast %33 : vector<16x128xf32> to vector<1x16x128xf32>
      tpu.vector_store %arg5[%c0_14, %c0_15, %c0_16], %36 {strides = array<i32>} : memref<1x16x128xf32, #tpu.memory_space<vmem>>, vector<1x16x128xf32>,
      %c0_17 = arith.constant 0 : index
      %c0_18 = arith.constant 0 : index
      %37 = vector.load %arg6[%c0_17, %c0_18] : memref<16x256xf32, #tpu.memory_space<vmem>>, vector<16x128xf32>
      tpu.vector_store %arg6[%c0_17, %c0_18], %33 {strides = array<i32>} : memref<16x256xf32, #tpu.memory_space<vmem>>, vector<16x128xf32>,
      %c0_19 = arith.constant 0 : index
      %c128 = arith.constant 128 : index
      %38 = vector.load %arg6[%c0_19, %c128] : memref<16x256xf32, #tpu.memory_space<vmem>>, vector<16x128xf32>
      tpu.vector_store %arg6[%c0_19, %c128], %30 {strides = array<i32>} : memref<16x256xf32, #tpu.memory_space<vmem>>, vector<16x128xf32>,
    } else {
    }
    return
  }
  func.func @transform_0(%arg0: i32) -> (i32, i32) {
    %c0_i32 = arith.constant 0 : i32
    %c0_i32_0 = arith.constant 0 : i32
    %c0_i32_1 = arith.constant 0 : i32
    return %c0_i32, %c0_i32_0 : i32, i32
  }
  func.func @transform_1(%arg0: i32) -> (i32, i32, i32) {
    %c0_i32 = arith.constant 0 : i32
    %c0_i32_0 = arith.constant 0 : i32
    %c0_i32_1 = arith.constant 0 : i32
    return %arg0, %c0_i32, %c0_i32_0 : i32, i32, i32
  }
  func.func @transform_2(%arg0: i32) -> (i32, i32) {
    %c0_i32 = arith.constant 0 : i32
    %c0_i32_0 = arith.constant 0 : i32
    %c0_i32_1 = arith.constant 0 : i32
    return %c0_i32, %c0_i32_0 : i32, i32
  }
  func.func @transform_3(%arg0: i32) -> (i32, i32, i32) {
    %c0_i32 = arith.constant 0 : i32
    %c0_i32_0 = arith.constant 0 : i32
    %c0_i32_1 = arith.constant 0 : i32
    return %arg0, %c0_i32, %c0_i32_0 : i32, i32, i32
  }
  func.func @transform_4(%arg0: i32) -> (i32, i32, i32) {
    %c0_i32 = arith.constant 0 : i32
    %c0_i32_0 = arith.constant 0 : i32
    %c0_i32_1 = arith.constant 0 : i32
    return %arg0, %c0_i32, %c0_i32_0 : i32, i32, i32
  }
}

</mosaic_0001>

<bundles_post_ra>
// kernel: tpu_custom_call.1
= control target key start
LH: loop header
LB: loop body
LE: loop exit
PB: predicated region body
PF: predicated region fallthrough
CT: control target
= control target key end

     0   :  { %s1663_s0 = inlined_call_operand.hbm [shape: f32[1,256], index: 0, kind: input, shape index: {}]   ;;  %s1664_s1 = inlined_call_operand.hbm [shape: f32[4,16,16], index: 1, kind: input, shape index: {}]   ;;  %s1665_s2 = inlined_call_operand.hbm [shape: bf16[128,512], index: 2, kind: input, shape index: {}]   ;;  %s1666_s3 = inlined_call_operand.hbm [shape: f32[4,16,512], index: 3, kind: input, shape index: {}]   ;;  %s1667_s4 = inlined_call_operand.hbm [shape: f32[4,16,128], index: 4, kind: output, shape index: {}]  }
   0x1   :  { %1673 = sst [smem:[#allocation17_spill]] %s1663_s0 }
   0x2   :  { %9 = vsyncpa [#allocation4], 0 }
   0x3   :  { %10 = vsyncpa [#allocation7], 0 }
   0x4   :  { %12 = vsyncpa [#allocation7 + $0x1], 0 }
   0x5   :  { %13 = vsyncpa [#allocation10], 0 }
   0x6   :  { %15 = vsyncpa [#allocation10 + $0x1], 0 }
   0x7   :  { %16 = vsyncpa [#allocation5], 0 }
   0x8   :  { %18 = vsyncpa [#allocation5 + $0x1], 0  ;;  %s1357_s15 = smov 0   ;;  %s1359_s16 = smov 0  }
   0x9   :  { %s1361_s17 = smov 0   ;;  %s1363_s18 = smov 0  }
   0xa LB: > { %s1378_s19 = sadd.s32 4294967295, %s1315_s18   ;;  %s887_s20 = sadd.s32 4294967294, %s1315_s18   ;;  %s1315_s18 = sphi %s1363_s18, %s1697_s18   ;;  %s1311_s17 = sphi %s1361_s17, %s1696_s17   ;;  %s1307_s16 = sphi %s1359_s16, %s1695_s16   ;;  %s1303_s15 = sphi %s1357_s15, %s1694_s15  }
   0xb   : > { %s1382_s21 = sadd.s32 1, %s1315_s18   ;;  %s52_s22 = sadd.s32 1, %s1311_s17 }
   0xc   : > { %s49_s23 = ssub.s32 %s1315_s18, %s1382_s21  ;;  %p59_p0 = scmp.ne.s32.totalorder %s1311_s17, %s1307_s16 }
   0xd   : > { %p50_p1 = scmp.eq.s32.totalorder %s49_s23, 0  ;;  %p60_p2 = scmp.eq.s32.totalorder %s1315_s18, 0 }
   0xe   : > { %p65_p3 = scmp.ne.s32.totalorder %s1307_s16, %s1303_s15  ;;  %p1668_p4 = scmp.eq.s32.totalorder %s1378_s19, 0 }
   0xf   : > { %s1394_s24 = scalar_select %p50_p1, %s1311_s17, %s52_s22  }
  0x10   : > { %p1396_p5 = por %p60_p2, %p59_p0  ;;  %p1402_p6 = por %p1668_p4, %p65_p3 }
  0x11   : > { %p136_p7 = scmp.eq.s32.totalorder %s1378_s19, 3  ;;  %p142_p8 = scmp.eq.s32.totalorder %s887_s20, 3 }
  0x12   : > { %s1674_s25 = scalar_select %p1396_p5, 1, 0 }
  0x13   : > { %s1675_s26 = scalar_select %p1402_p6, 1, 0 }
  0x14   : > { %p888_p9 = scmp.ge.s32.totalorder %s1315_s18, 1  ;;  %p149_p10 = scmp.lt.s32.totalorder %s1315_s18, 5 }
  0x15   : > { %p1409_p11 = por %p136_p7, %p59_p0  ;;  %p1413_p12 = por %p142_p8, %p65_p3 }
  0x16   : > { %p1417_p13 = pnand %p888_p9, %p149_p10  ;;  %s1317_s30 = smov [#allocation8]  }
  0x17   : > { %s1676_s27 = scalar_select %p1409_p11, 1, 0 }
  0x18   : > { %s1677_s28 = scalar_select %p1413_p12, 1, 0 }
  0x19   : > { %s1678_s29 = scalar_select %p1417_p13, 1, 0 }
  0x1a   : > { %p973_p2 = pneg %p1417_p13  ;;  %s172_s5 = sshll.u32 %s1317_s30, 4  ;;  %s173_s5 = int_to_ptr.vmem [resolvable:$true] %s172_s5 }
  0x1b   : > { %s1318_s7 = smov [#allocation3]   ;;  %s1121_s11 = scalar_lea.hbm %s1665_s2, 4096 }
  0x1c   : > { %p1426_p0 = pnand %p973_p2, %p1668_p4  ;;  %s162_s8 = sshll.u32 %s1318_s7, 4  ;;  %s163_s8 = int_to_ptr.vmem [resolvable:$true] %s162_s8 }
  0x1d   : > { %p1122_p7 = scmp.ne.s32.totalorder %s1665_s2, %s1121_s11  ;;  %p1128_p2 = scmp.lt.u32.totalorder %s1121_s11, %s1665_s2 }
  0x1e   : > { %p1123_p8 = pneg %p1426_p0 }
  0x20   : > { %p1124_p9 = pnand %p1123_p8, %p1122_p7 }
  0x22   : > { %p1125_p10 = pneg %p1124_p9 }
  0x24   : > { %p1130_p1 = pnand %p1128_p2, %p1125_p10 }
  0x26   : > { %1133 = shalt.err (!%p1130_p1)
}
  0x27   : > { %s1134_s22 = scalar_lea.vmem %s173_s5, 4096  ;;  %p1142_p11 = scmp.lt.s32.totalorder %s173_s5, %s173_s5 }
  0x28   : > { %p1135_p4 = scmp.ne.s32.totalorder %s173_s5, %s1134_s22  ;;  %p1143_p6 = scmp.lt.s32.totalorder %s1134_s22, %s1134_s22 }
  0x2a   : > { %p1137_p3 = pnand %p1135_p4, %p1123_p8  ;;  %p1144_p13 = por %p1143_p6, %p1142_p11 }
  0x2c   : > { %p1138_p12 = pneg %p1137_p3 }
  0x2e   : > { %p1145_p5 = pnand %p1144_p13, %p1138_p12 }
  0x30   : > { %1148 = shalt.err (!%p1145_p5)
}
  0x31   : > { %s1319_s23 = smov 256   ;;  %s1320_s30 = smov 16  }
  0x32   : > { %979 = dma.hbm_to_vmem [thread:$0]  (!%p1426_p0), %s1665_s2, 4096, %s173_s5, [#allocation7], %s1319_s23, %s1319_s23, %s1320_s30  }
  0x33   : > { %p1680_p1 = scmp.ne.s32.totalorder %s1674_s25, 0  ;;  %p1681_p7 = scmp.lt.s32.totalorder %s1315_s18, 4 }
  0x34   : > { %s1683_s0 = sld [smem:[#allocation17_spill]] }
  0x35   : > { %p1457_p4 = pnand %p1681_p7, %p1680_p1 }
  0x37   : > { %s1682_s10 = scalar_select %p1457_p4, 1, 0 }
  0x3a   : > { %s1149_s13 = scalar_lea.hbm %s1683_s0, 32 }
  0x3b   : > { %p1150_p5 = scmp.ne.s32.totalorder %s1683_s0, %s1149_s13  ;;  %p1156_p12 = scmp.lt.u32.totalorder %s1149_s13, %s1683_s0 }
  0x3d   : > { %p1152_p6 = pnand %p1150_p5, %p1123_p8 }
  0x3f   : > { %p1153_p11 = pneg %p1152_p6 }
  0x41   : > { %p1158_p13 = pnand %p1156_p12, %p1153_p11 }
  0x43   : > { %1161 = shalt.err (!%p1158_p13)
}
  0x44   : > { %s1162_s22 = scalar_lea.vmem %s163_s8, 32  ;;  %p1170_p2 = scmp.lt.s32.totalorder %s163_s8, %s163_s8 }
  0x45   : > { %p1163_p3 = scmp.ne.s32.totalorder %s163_s8, %s1162_s22  ;;  %p1171_p1 = scmp.lt.s32.totalorder %s1162_s22, %s1162_s22 }
  0x47   : > { %p1165_p9 = pnand %p1163_p3, %p1123_p8  ;;  %p1172_p7 = por %p1171_p1, %p1170_p2 }
  0x49   : > { %p1166_p10 = pneg %p1165_p9 }
  0x4b   : > { %p1173_p4 = pnand %p1172_p7, %p1166_p10 }
  0x4d   : > { %1176 = shalt.err (!%p1173_p4)
}
  0x4e   : > { %976 = dma.hbm_to_vmem [thread:$0]  (!%p1426_p0), %s1683_s0, 32, %s163_s8, [#allocation4]  }
  0x4f   : > { %s186_s7 = sand.u32 1, %s1315_s18   ;;  %s1483_s9 = sand.u32 1, %s1311_s17  }
  0x50   : > { %s892_s11 = sshll.u32 %s1483_s9, 4  ;;  %s952_s12 = sshll.u32 %s1315_s18, 8 }
  0x51   : > { %s1490_s20 = scalar_lea.hbm %s1664_s1, %s952_s12  ;;  %s190_s6 = scalar_lea.vmem [#allocation6], %s892_s11 }
  0x52   : > { %s197_s5 = sshll.u32 %s190_s6, 4  ;;  %s1494_s8 = scalar_lea.sflag [#allocation7], %s186_s7  ;;  %s1492_s5 = int_to_ptr.vmem [resolvable:$true] %s197_s5 }
  0x53   : > { %s1177_s25 = scalar_lea.hbm %s1490_s20, 256  ;;  %p1684_p8 = scmp.ne.s32.totalorder %s1682_s10, 0 }
  0x54   : > { %p1178_p0 = scmp.ne.s32.totalorder %s1490_s20, %s1177_s25  ;;  %s1182_s30 = scalar_lea.hbm %s1664_s1, 1024 }
  0x55   : > { %p1179_p4 = pneg %p1684_p8  ;;  %p1183_p11 = scmp.lt.u32.totalorder %s1490_s20, %s1664_s1 }
  0x56   : > { %p1184_p12 = scmp.lt.u32.totalorder %s1182_s30, %s1177_s25  ;;  %p1186_p3 = scmp.lt.u32.totalorder %s1177_s25, %s1490_s20 }
  0x57   : > { %p1180_p5 = pnand %p1179_p4, %p1178_p0 }
  0x58   : > { %p1185_p13 = por %p1184_p12, %p1183_p11 }
  0x59   : > { %p1181_p6 = pneg %p1180_p5 }
  0x5a   : > { %p1187_p9 = por %p1186_p3, %p1185_p13 }
  0x5c   : > { %p1188_p10 = pnand %p1187_p9, %p1181_p6 }
  0x5e   : > { %1191 = shalt.err (!%p1188_p10)
}
  0x5f   : > { %s1192_s7 = scalar_lea.vmem %s1492_s5, 256  ;;  %s1321_s11 = smov [#allocation6]  }
  0x60   : > { %p1193_p2 = scmp.ne.s32.totalorder %s1492_s5, %s1192_s7  ;;  %s1197_s14 = sshll.u32 %s1321_s11, 4  ;;  %s1198_s14 = int_to_ptr.vmem [resolvable:$false] %s1197_s14 }
  0x61   : > { %s1199_s6 = scalar_lea.vmem %s1198_s14, 512  ;;  %p1200_p0 = scmp.lt.s32.totalorder %s1492_s5, %s1198_s14 }
  0x62   : > { %p1195_p1 = pnand %p1193_p2, %p1179_p4  ;;  %p1201_p5 = scmp.lt.s32.totalorder %s1199_s6, %s1192_s7 }
  0x64   : > { %p1196_p7 = pneg %p1195_p1  ;;  %p1202_p11 = por %p1201_p5, %p1200_p0 }
  0x66   : > { %p1203_p12 = pnand %p1202_p11, %p1196_p7 }
  0x68   : > { %1206 = shalt.err (!%p1203_p12)
}
  0x69   : > { %s1322_s25 = smov 128   ;;  %s1323_s22 = smov 8  }
  0x6a   : > { %983 = dma.hbm_to_vmem [thread:$0]  (!%p1684_p8), %s1490_s20, 256, %s1492_s5, %s1494_s8, %s1322_s25, %s1322_s25, %s1323_s22  }
  0x6b   : > { %s895_s23 = sshll.u32 %s1483_s9, 6  ;;  %s953_s30 = sshll.u32 %s1315_s18, 10 }
  0x6c   : > { %s1527_s7 = scalar_lea.hbm %s1666_s3, %s953_s30  ;;  %s211_s11 = scalar_lea.vmem [#allocation9], %s895_s23 }
  0x6d   : > { %s218_s14 = sshll.u32 %s211_s11, 4  ;;  %s208_s6 = scalar_lea.sflag [#allocation10], %s1483_s9  ;;  %s1529_s14 = int_to_ptr.vmem [resolvable:$true] %s218_s14 }
  0x6e   : > { %s1207_s0 = scalar_lea.hbm %s1527_s7, 1024  ;;  %s1212_s8 = scalar_lea.hbm %s1666_s3, 4096 }
  0x6f   : > { %p1208_p6 = scmp.ne.s32.totalorder %s1527_s7, %s1207_s0  ;;  %p1213_p9 = scmp.lt.u32.totalorder %s1527_s7, %s1666_s3 }
  0x70   : > { %p1214_p10 = scmp.lt.u32.totalorder %s1212_s8, %s1207_s0  ;;  %p1216_p1 = scmp.lt.u32.totalorder %s1207_s0, %s1527_s7 }
  0x71   : > { %p1210_p13 = pnand %p1208_p6, %p1179_p4 }
  0x72   : > { %p1215_p2 = por %p1214_p10, %p1213_p9 }
  0x73   : > { %p1211_p3 = pneg %p1210_p13 }
  0x74   : > { %p1217_p7 = por %p1216_p1, %p1215_p2 }
  0x76   : > { %p1218_p0 = pnand %p1217_p7, %p1211_p3 }
  0x78   : > { %1221 = shalt.err (!%p1218_p0)
}
  0x79   : > { %s1222_s23 = scalar_lea.vmem %s1529_s14, 1024  ;;  %s1324_s30 = smov [#allocation9]  }
  0x7a   : > { %p1223_p5 = scmp.ne.s32.totalorder %s1529_s14, %s1222_s23  ;;  %s1227_s12 = sshll.u32 %s1324_s30, 4  ;;  %s1228_s12 = int_to_ptr.vmem [resolvable:$false] %s1227_s12 }
  0x7b   : > { %s1229_s13 = scalar_lea.vmem %s1228_s12, 2048  ;;  %p1230_p6 = scmp.lt.s32.totalorder %s1529_s14, %s1228_s12 }
  0x7c   : > { %p1225_p11 = pnand %p1223_p5, %p1179_p4  ;;  %p1231_p13 = scmp.lt.s32.totalorder %s1229_s13, %s1222_s23 }
  0x7e   : > { %p1226_p12 = pneg %p1225_p11  ;;  %p1232_p9 = por %p1231_p13, %p1230_p6 }
  0x80   : > { %p1233_p10 = pnand %p1232_p9, %p1226_p12 }
  0x82   : > { %1236 = shalt.err (!%p1233_p10)
}
  0x83   : > { %s1325_s0 = smov 512   ;;  %s1326_s11 = smov 32  }
  0x84   : > { %986 = dma.hbm_to_vmem [thread:$0]  (!%p1684_p8), %s1527_s7, 1024, %s1529_s14, %s208_s6, %s1325_s0, %s1325_s0, %s1326_s11  }
  0x85   : > { %p1685_p4 = scmp.ne.s32.totalorder %s1678_s29, 0 }
  0x86   : > { %p1686_p3 = scmp.eq.s32.totalorder (!%p1685_p4), %s1378_s19, 0 }
  0x87   : > { %230 = sbr.rel (%p1685_p4) target bundleno = 684 (0x2ac), region = 36 }
  0x8e   : > { %1282 = dma.done.wait (%p1686_p3), [#allocation4], 32   ;;  %p1687_p2 = pmov %p1686_p3 }
  0x8f   : > { %s236_s20 = sand.u32 1, %s1378_s19   ;;  %s1565_s5 = sand.u32 1, %s1307_s16  }
  0x90   : > { %1284 = vsyncadd (%p1687_p2), [#allocation4], 4294967264  ;;  %s900_s8 = sshll.u32 %s1565_s5, 4  ;;  %s237_s10 = scalar_lea.sflag [#allocation7], %s236_s20 }
  0x91   : > { %s1568_s9 = scalar_lea.vmem [#allocation6], %s900_s8  ;;  %p1688_p8 = scmp.ne.s32.totalorder %s1675_s26, 0 }
  0x93   : > { %1286 = dma.done.wait (%p1688_p8), %s237_s10, 256  }
  0x94   : > { %1288 = vsyncadd (%p1688_p8), %s237_s10, 4294967040  ;;  %p1689_p1 = pmov %p1687_p2 }
  0x96   : > { %1290 = dma.done.wait (%p1689_p1), [#allocation7], 4096   ;;  %p1690_p7 = pmov %p1689_p1 }
  0x97   : > { %s902_s29 = sshll.u32 %s1565_s5, 6  ;;  %s250_s7 = scalar_lea.sflag [#allocation10], %s1565_s5 }
  0x98   : > { %1292 = vsyncadd (%p1690_p7), [#allocation7], 4294963200  ;;  %s1580_s14 = scalar_lea.vmem [#allocation9], %s902_s29 }
  0x99   : > { %1294 = dma.done.wait (%p1688_p8), %s250_s7, 1024  }
  0x9a   : > { %1296 = vsyncadd (%p1688_p8), %s250_s7, 4294966272  ;;  %s1586_s6 = scalar_lea.vmem [#allocation11], %s900_s8  ;;  %p1691_p0 = scmp.ne.s32.totalorder %s1378_s19, 0 }
  0x9b   : > { %v290_v0 = vlaneseq (!%p1691_p0)  ;;  %v905_v1 = vld [vmem:[#allocation3] ss:$0 sm:$0xff] (!%p1691_p0) }
  0x9c   : > { %287 = sbr.rel (%p1691_p0) target bundleno = 165 (0xa5), region = 56  ;;  %311 = vst [vmem:[%s1586_s6] sm:$0xff] (!%p1691_p0), %v905_v1  ;;  %312 = vst [vmem:[%s1586_s6 + $0x8] sm:$0xff] (!%p1691_p0), %v905_v1  ;;  %v288_v3 = vld [vmem:[#allocation3] sm:$0x3] (!%p1691_p0) }
  0x9d   : > { %v291_v2 = vshrl.u32 (!%p1691_p0), %v290_v0, 7 }
  0x9f   : > { %v292_v4 = vsub.s32 (!%p1691_p0), 0, %v291_v2  ;;  %v296_v5 = vsub.s32 (!%p1691_p0), 1, %v291_v2 }
  0xa1   : > { %v293_v6 = vrot.slane (!%p1691_p0), %v288_v3, %v292_v4  ;;  %v297_v7 = vrot.slane (!%p1691_p0), %v288_v3, %v296_v5 }
  0xa3   : > { %300 = vst [vmem:[#allocation2] sm:$0xff] %v293_v6  ;;  %302 = vst [vmem:[#allocation2 + $0x10] sm:$0xff] %v293_v6 }
  0xa4   : > { %301 = vst [vmem:[#allocation2 + $0x8] sm:$0xff] %v297_v7  ;;  %303 = vst [vmem:[#allocation2 + $0x18] sm:$0xff] %v297_v7 }
  0xa5 PF: > { %p906_p5 = scmp.le.s32.totalorder %s1378_s19, 0 }
  0xa6   : > { %v1327_v13 = vmov (!%p906_p5), 0.0   ;;  %v317_v15 = vld [vmem:[%s1568_s9] sm:$0xff] (!%p906_p5)  ;;  %v1043_v17 = vld [vmem:[#allocation8 + $0x8] ss:$16 sps:$4 sm:$0xff] (!%p906_p5)   ;;  %vm323_vm0 = vcmask (!%p906_p5), 130048   ;;  %v1328_v49 = vmov (!%p906_p5), 0  }
  0xa7   : > { %316 = sbr.rel (%p906_p5) target bundleno = 658 (0x292), region = 60  ;;  %394 = vmatprep.mubr.f32.mxu0 (!%p906_p5), %v1327_v13  ;;  %v1041_v16 = vld [vmem:[#allocation8 + $0x4] ss:$16 sps:$4 sm:$0xff] (!%p906_p5)   ;;  %v1045_v18 = vld [vmem:[#allocation8 + $0xc] ss:$16 sps:$4 sm:$0xff] (!%p906_p5)   ;;  %632 = vmatprep.mubr.bf16.mxu1 (!%p906_p5), %v1328_v49 }
  0xa8   : > { %600 = vmatprep.subr.bf16.mxu1 (!%p906_p5), %v1041_v16  ;;  %v1046_v19 = vld [vmem:[#allocation8] ss:$16 sps:$4 sm:$0xff] (!%p906_p5)   ;;  %v1047_v20 = vld [vmem:[#allocation8 + $0x24] ss:$16 sps:$4 sm:$0xff] (!%p906_p5)   ;;  %v318_v21 = vld [vmem:[%s1568_s9 + $0x8] sm:$0xff] (!%p906_p5) }
  0xa9   : > { %601 = vmatpush1.bf16.msra.mxu1 (!%p906_p5), %v1046_v19  ;;  %v1049_v22 = vld [vmem:[#allocation8 + $0x28] ss:$16 sps:$4 sm:$0xff] (!%p906_p5)   ;;  %v1051_v23 = vld [vmem:[#allocation8 + $0x2c] ss:$16 sps:$4 sm:$0xff] (!%p906_p5)   ;;  %v1052_v24 = vld [vmem:[#allocation8 + $0x20] ss:$16 sps:$4 sm:$0xff] (!%p906_p5)  }
  0xaa   : > { %602 = vmatprep.subr.bf16.mxu1 (!%p906_p5), %v1047_v20  ;;  %v1053_v25 = vld [vmem:[#allocation8 + $0x44] ss:$16 sps:$4 sm:$0xff] (!%p906_p5)   ;;  %v1057_v26 = vld [vmem:[#allocation8 + $0x4c] ss:$16 sps:$4 sm:$0xff] (!%p906_p5)   ;;  %v1058_v27 = vld [vmem:[#allocation8 + $0x40] ss:$16 sps:$4 sm:$0xff] (!%p906_p5)  }
  0xab   : > { %v320_v8 = vld [vmem:[#allocation2 + $0x8] sm:$0xff] (!%p906_p5)  ;;  %v322_v9 = vld [vmem:[#allocation2 + $0x18] sm:$0xff] (!%p906_p5)  ;;  %v1064_v31 = vld [vmem:[#allocation8 + $0x60] ss:$16 sps:$4 sm:$0xff] (!%p906_p5)  }
  0xac   : > { %v319_v10 = vld [vmem:[#allocation2] sm:$0xff] (!%p906_p5)  ;;  %v955_v11 = vpack.c.bf16 (!%p906_p5), %v322_v9, %v320_v8  ;;  %v321_v12 = vld [vmem:[#allocation2 + $0x10] sm:$0xff] (!%p906_p5)  ;;  %v1055_v29 = vld [vmem:[#allocation8 + $0x48] ss:$16 sps:$4 sm:$0xff] (!%p906_p5)  }
  0xad   : > { %v957_v14 = vpack.c.bf16 (!%p906_p5), %v321_v12, %v319_v10  ;;  %603 = vmatpush1.bf16.msra.mxu1 (!%p906_p5), %v1052_v24  ;;  %v1059_v28 = vld [vmem:[#allocation8 + $0x64] ss:$16 sps:$4 sm:$0xff] (!%p906_p5)   ;;  %v1063_v30 = vld [vmem:[#allocation8 + $0x6c] ss:$16 sps:$4 sm:$0xff] (!%p906_p5)   ;;  %v1061_v33 = vld [vmem:[#allocation8 + $0x68] ss:$16 sps:$4 sm:$0xff] (!%p906_p5)  }
  0xae   : > { %956 = vmatprep.subr.bf16.mxu0 %v955_v11  ;;  %604 = vmatprep.subr.bf16.mxu1 %v1053_v25  ;;  %v1065_v32 = vld [vmem:[#allocation8 + $0x84] ss:$16 sps:$4 sm:$0xff]   ;;  %v1069_v34 = vld [vmem:[#allocation8 + $0x8c] ss:$16 sps:$4 sm:$0xff]   ;;  %v1070_v35 = vld [vmem:[#allocation8 + $0x80] ss:$16 sps:$4 sm:$0xff]  }
  0xaf   : > { %958 = vmatpush1.bf16.msra.mxu0 %v957_v14  ;;  %v1071_v36 = vld [vmem:[#allocation8 + $0xa4] ss:$16 sps:$4 sm:$0xff]   ;;  %v1067_v37 = vld [vmem:[#allocation8 + $0x88] ss:$16 sps:$4 sm:$0xff]   ;;  %v1075_v38 = vld [vmem:[#allocation8 + $0xac] ss:$16 sps:$4 sm:$0xff]  }
  0xb0   : > { %643 = vmatprep.subr.bf16.mxu0 %v1045_v18  ;;  %v1076_v39 = vld [vmem:[#allocation8 + $0xa0] ss:$16 sps:$4 sm:$0xff]   ;;  %v1077_v40 = vld [vmem:[#allocation8 + $0xc4] ss:$16 sps:$4 sm:$0xff]   ;;  %v1073_v41 = vld [vmem:[#allocation8 + $0xa8] ss:$16 sps:$4 sm:$0xff]  }
  0xb1   : > { %605 = vmatpush1.bf16.msra.mxu1 %v1058_v27  ;;  %v1081_v42 = vld [vmem:[#allocation8 + $0xcc] ss:$16 sps:$4 sm:$0xff]   ;;  %v1079_v43 = vld [vmem:[#allocation8 + $0xc8] ss:$16 sps:$4 sm:$0xff]   ;;  %v1082_v44 = vld [vmem:[#allocation8 + $0xc0] ss:$16 sps:$4 sm:$0xff]  }
  0xb2   : > { %907 = vmatmul.mubr.msk.f32.vlgmr.msra.gmra.mrb[0].mxu0 %vm323_vm0, %v317_v15  ;;  %606 = vmatprep.subr.bf16.mxu1 %v1059_v28  ;;  %v1083_v45 = vld [vmem:[#allocation8 + $0xe4] ss:$16 sps:$4 sm:$0xff]   ;;  %v1085_v46 = vld [vmem:[#allocation8 + $0xe8] ss:$16 sps:$4 sm:$0xff]   ;;  %v1087_v47 = vld [vmem:[#allocation8 + $0xec] ss:$16 sps:$4 sm:$0xff]  }
  0xb3   : > { %400 = vmatprep.mubr.f32.mxu0 %v1327_v13  ;;  %644 = vmatpush1.bf16.msra.mxu0 %v1043_v17  ;;  %v1088_v48 = vld [vmem:[#allocation8 + $0xe0] ss:$16 sps:$4 sm:$0xff]   ;;  %v687_v56 = vld [vmem:[%s1580_s14 + $0x8] sm:$0xff]  ;;  %v689_v14 = vld [vmem:[%s1580_s14 + $0x18] sm:$0xff] }
  0xb4   : > { %645 = vmatprep.subr.bf16.mxu0 %v1051_v23  ;;  %v686_v55 = vld [vmem:[%s1580_s14] sm:$0xff]  ;;  %v691_v63 = vld [vmem:[%s1580_s14 + $0x28] sm:$0xff]  ;;  %v688_v9 = vld [vmem:[%s1580_s14 + $0x10] sm:$0xff] }
  0xb5   : > { %607 = vmatpush1.bf16.msra.mxu1 %v1064_v31  ;;  %v690_v59 = vld [vmem:[%s1580_s14 + $0x20] sm:$0xff]  ;;  %v692_v11 = vld [vmem:[%s1580_s14 + $0x30] sm:$0xff]  ;;  %v693_v18 = vld [vmem:[%s1580_s14 + $0x38] sm:$0xff] }
  0xb6   : > { %908 = vmatmul.mubr.msk.f32.gmra.mrb[2].mxu0 %vm323_vm0, %v318_v21  ;;  %608 = vmatprep.subr.bf16.mxu1 %v1065_v32 }
  0xb7   : > { %646 = vmatpush1.bf16.msra.mxu0 %v1049_v22  ;;  %675 = vmatprep.mubr.bf16.mxu0 %v1328_v49 }
  0xb8   : > { %647 = vmatprep.subr.bf16.mxu0 %v1057_v26 }
  0xb9   : > { %609 = vmatpush1.bf16.msra.mxu1 %v1070_v35 }
  0xba   : > { %610 = vmatprep.subr.bf16.mxu1 %v1071_v36 }
  0xbb   : > { %648 = vmatpush1.bf16.msra.mxu0 %v1055_v29 }
  0xbc   : > { %649 = vmatprep.subr.bf16.mxu0 %v1063_v30 }
  0xbd   : > { %611 = vmatpush1.bf16.msra.mxu1 %v1076_v39 }
  0xbe   : > { %612 = vmatprep.subr.bf16.mxu1 %v1077_v40 }
  0xbf   : > { %650 = vmatpush1.bf16.msra.mxu0 %v1061_v33 }
  0xc0   : > { %651 = vmatprep.subr.bf16.mxu0 %v1069_v34 }
  0xc1   : > { %613 = vmatpush1.bf16.msra.mxu1 %v1082_v44 }
  0xc2   : > { %614 = vmatprep.subr.bf16.mxu1 %v1083_v45 }
  0xc3   : > { %652 = vmatpush1.bf16.msra.mxu0 %v1067_v37 }
  0xc4   : > { %653 = vmatprep.subr.bf16.mxu0 %v1075_v38 }
  0xc5   : > { %615 = vmatpush1.bf16.msra.mxu1 %v1088_v48 }
  0xc7   : > { %654 = vmatpush1.bf16.msra.mxu0 %v1073_v41 }
  0xc8   : > { %655 = vmatprep.subr.bf16.mxu0 %v1081_v42 }
  0xcb   : > { %656 = vmatpush1.bf16.msra.mxu0 %v1079_v43 }
  0xcc   : > { %657 = vmatprep.subr.bf16.mxu0 %v1087_v47 }
  0xcf   : > { %658 = vmatpush1.bf16.msra.mxu0 %v1085_v46 }
 0x185   : > { %v396_v50 = vpop.f32.mrb[0].mxu0 }
 0x186   : > { %v1597_v51 = vpop.f32.mrb[1].mxu0 }
 0x189   : > { %v402_v52 = vpop.f32.mrb[2].mxu0 }
 0x18a   : > { %v407_v53 = vpack.c.bf16 %v402_v52, %v396_v50  ;;  %v1599_v54 = vpop.f32.mrb[3].mxu0 }
 0x18c   : > { %633 = vmatmul.mubr.bf16.vlgmr.msra.gmra.mrb[0].mxu1 %v407_v53  ;;  %676 = vmatmul.mubr.bf16.vlgmr.msra.gmra.mrb[4].mxu0 %v407_v53 }
 0x25f   : > { %v634_v57 = vpop.f32.mrb[0].mxu1  ;;  %v677_v58 = vpop.f32.mrb[4].mxu0 }
 0x260   : > { %v694_v60 = vadd.f32 %v686_v55, %v634_v57  ;;  %v636_v61 = vpop.f32.mrb[1].mxu1  ;;  %v679_v62 = vpop.f32.mrb[5].mxu0  ;;  %v696_v13 = vadd.f32 %v688_v9, %v677_v58 }
 0x261   : > { %v695_v0 = vadd.f32 %v687_v56, %v636_v61  ;;  %v638_v1 = vpop.f32.mrb[2].mxu1  ;;  %v681_v2 = vpop.f32.mrb[6].mxu0  ;;  %v697_v16 = vadd.f32 %v689_v14, %v679_v62 }
 0x262   : > { %v941_v3 = vmul.f32 -1.442695, %v694_v60  ;;  %v698_v4 = vadd.f32 %v690_v59, %v638_v1  ;;  %v640_v5 = vpop.f32.mrb[3].mxu1  ;;  %v683_v6 = vpop.f32.mrb[7].mxu0  ;;  %v700_v15 = vadd.f32 %v692_v11, %v681_v2  ;;  %v943_v17 = vmul.f32 -1.442695, %v696_v13 }
 0x263   : > { %v942_v7 = vmul.f32 -1.442695, %v695_v0  ;;  %v699_v8 = vadd.f32 %v691_v63, %v640_v5  ;;  %v701_v21 = vadd.f32 %v693_v18, %v683_v6 }
 0x264   : > { %1089 = vpow2.f32 %v941_v3  ;;  %v944_v10 = vmul.f32 -1.442695, %v698_v4  ;;  %v946_v19 = vmul.f32 -1.442695, %v700_v15 }
 0x265   : > { %v945_v12 = vmul.f32 -1.442695, %v699_v8  ;;  %1091 = vpow2.f32 %v942_v7 }
 0x266   : > { %1093 = vpow2.f32 %v944_v10 }
 0x267   : > { %1095 = vpow2.f32 %v945_v12 }
 0x268   : > { %1097 = vtanh.f32 %v697_v16 }
 0x269   : > { %1099 = vpow2.f32 %v943_v17 }
 0x26a   : > { %1101 = vpow2.f32 %v946_v19 }
 0x26e   : > { %v1090_v20 = vpop.eup %1089 }
 0x26f   : > { %v720_v22 = vadd.f32 1.0, %v1090_v20  ;;  %v1092_v23 = vpop.eup %1091 }
 0x270   : > { %v1094_v24 = vpop.eup %1093  ;;  %v721_v25 = vadd.f32 1.0, %v1092_v23 }
 0x271   : > { %1103 = vrcp.f32 %v720_v22  ;;  %v723_v26 = vadd.f32 1.0, %v1094_v24  ;;  %v1096_v27 = vpop.eup %1095 }
 0x272   : > { %1105 = vtanh.f32 %v701_v21  ;;  %v724_v28 = vadd.f32 1.0, %v1096_v27  ;;  %v1098_v29 = vpop.eup %1097 }
 0x273   : > { %1107 = vrcp.f32 %v721_v25  ;;  %v1100_v30 = vpop.eup %1099 }
 0x274   : > { %1109 = vrcp.f32 %v723_v26  ;;  %v1102_v31 = vpop.eup %1101  ;;  %v722_v36 = vadd.f32 1.0, %v1100_v30 }
 0x275   : > { %1111 = vrcp.f32 %v724_v28  ;;  %v725_v42 = vadd.f32 1.0, %v1102_v31 }
 0x276   : > { %1113 = vrcp.f32 %v722_v36 }
 0x27b   : > { %v1104_v32 = vpop.eup %1103 }
 0x27c   : > { %v1106_v33 = vpop.eup %1105  ;;  %v742_v34 = vmul.f32 %v1104_v32, %v1098_v29 }
 0x27d   : > { %v1108_v35 = vpop.eup %1107 }
 0x27e   : > { %v1110_v37 = vpop.eup %1109  ;;  %v740_v38 = vmul.f32 %v1108_v35, %v1597_v51 }
 0x27f   : > { %v743_v39 = vmul.f32 %v1110_v37, %v1106_v33  ;;  %v1112_v40 = vpop.eup %1111 }
 0x280   : > { %v744_v41 = vadd.f32 %v742_v34, %v740_v38  ;;  %v741_v43 = vmul.f32 %v1112_v40, %v1599_v54  ;;  %v1114_v45 = vpop.eup %1113 }
 0x282   : > { %1115 = vtanh.f32 %v744_v41  ;;  %754 = vst [vmem:[#allocation2 + $0x8] sm:$0xff] %v744_v41  ;;  %v745_v44 = vadd.f32 %v743_v39, %v741_v43 }
 0x283   : > { %1117 = vrcp.f32 %v725_v42 }
 0x284   : > { %1119 = vtanh.f32 %v745_v44  ;;  %755 = vst [vmem:[#allocation2 + $0x18] sm:$0xff] %v745_v44 }
 0x28c   : > { %v1116_v46 = vpop.eup %1115 }
 0x28d   : > { %v748_v47 = vmul.f32 %v1116_v46, %v1114_v45  ;;  %v1118_v48 = vpop.eup %1117 }
 0x28e   : > { %v1120_v49 = vpop.eup %1119 }
 0x28f   : > { %750 = vst [vmem:[%s1586_s6] sm:$0xff] %v748_v47  ;;  %752 = vst [vmem:[#allocation2] sm:$0xff] %v748_v47  ;;  %v749_v50 = vmul.f32 %v1120_v49, %v1118_v48 }
 0x291   : > { %751 = vst [vmem:[%s1586_s6 + $0x8] sm:$0xff] %v749_v50  ;;  %753 = vst [vmem:[#allocation2 + $0x10] sm:$0xff] %v749_v50 }
 0x292 PF: > { %s954_s26 = sshll.u32 %s1378_s19, 8  ;;  %s770_s30 = sshll.u32 %s1586_s6, 4  ;;  %s1620_s30 = int_to_ptr.vmem [resolvable:$true] %s770_s30 }
 0x293   : > { %s1617_s23 = scalar_lea.hbm %s1667_s4, %s954_s26  ;;  %s757_s12 = scalar_lea.sflag [#allocation5], %s1565_s5 }
 0x294   : > { %s1237_s13 = scalar_lea.vmem %s1620_s30, 256  ;;  %p1692_p12 = scmp.ne.s32.totalorder %s1676_s27, 0 }
 0x295   : > { %p1238_p11 = scmp.ne.s32.totalorder %s1620_s30, %s1237_s13  ;;  %s1329_s0 = smov [#allocation11]  }
 0x296   : > { %s1241_s11 = sshll.u32 %s1329_s0, 4  ;;  %s1242_s11 = int_to_ptr.vmem [resolvable:$false] %s1241_s11 }
 0x297   : > { %p1239_p6 = pnand %p1238_p11, %p1692_p12  ;;  %s1243_s19 = scalar_lea.vmem %s1242_s11, 512 }
 0x298   : > { %p1244_p9 = scmp.lt.s32.totalorder %s1620_s30, %s1242_s11  ;;  %p1245_p10 = scmp.lt.s32.totalorder %s1243_s19, %s1237_s13 }
 0x299   : > { %p1240_p13 = pneg %p1239_p6 }
 0x29a   : > { %p1246_p4 = por %p1245_p10, %p1244_p9 }
 0x29c   : > { %p1247_p3 = pnand %p1246_p4, %p1240_p13 }
 0x29e   : > { %1250 = shalt.err (!%p1247_p3)
}
 0x29f   : > { %s1251_s20 = scalar_lea.hbm %s1617_s23, 256  ;;  %s1255_s9 = scalar_lea.hbm %s1667_s4, 1024 }
 0x2a0   : > { %p1252_p2 = scmp.ne.s32.totalorder %s1617_s23, %s1251_s20  ;;  %p1256_p7 = scmp.lt.u32.totalorder %s1617_s23, %s1667_s4 }
 0x2a1   : > { %p1257_p0 = scmp.lt.u32.totalorder %s1255_s9, %s1251_s20  ;;  %p1259_p11 = scmp.lt.u32.totalorder %s1251_s20, %s1617_s23 }
 0x2a2   : > { %p1253_p8 = pnand %p1252_p2, %p1692_p12 }
 0x2a3   : > { %p1258_p5 = por %p1257_p0, %p1256_p7 }
 0x2a4   : > { %p1254_p1 = pneg %p1253_p8 }
 0x2a5   : > { %p1260_p6 = por %p1259_p11, %p1258_p5 }
 0x2a7   : > { %p1261_p13 = pnand %p1260_p6, %p1254_p1 }
 0x2a9   : > { %1264 = shalt.err (!%p1261_p13)
}
 0x2aa   : > { %s1330_s14 = smov 128   ;;  %s1331_s6 = smov 8  }
 0x2ab   : > { %971 = dma.vmem_to_hbm [thread:$0]  (%p1692_p12), %s1620_s30, 256, %s1617_s23, %s757_s12, %s1330_s14, %s1330_s14, %s1331_s6  }
 0x2ac PF: > { %p996_p9 = scmp.ge.s32.totalorder %s1315_s18, 2  ;;  %s785_s26 = sand.u32 1, %s1303_s15  }
 0x2ad   : > { %p1693_p10 = scmp.ne.s32.totalorder %s1677_s28, 0  ;;  %s786_s25 = scalar_lea.sflag [#allocation5], %s785_s26 }
 0x2af   : > { %p988_p4 = pnand %p996_p9, %p1693_p10 }
 0x2b1   : > { %1298 = dma.done.wait (!%p988_p4), %s786_s25, 256  }
 0x2b2   : > { %1300 = vsyncadd (!%p988_p4), %s786_s25, 4294967040  ;;  %p21_p3 = scmp.ge.s32.totalorder %s1382_s21, 6   ;;  %s1694_s15 = smov %s1307_s16 }
 0x2b3   : > { %s1695_s16 = smov %s1311_s17  ;;  %s1696_s17 = smov %s1394_s24 }
 0x2b4   : > { %s1697_s18 = smov %s1382_s21  ;;  %23 = sbr.rel (!%p21_p3) target bundleno = 10 (0xa), region = 111 }
 0x2bb   :  { %791 = vsyncpa [#allocation4], 1 }
 0x2bc   :  { %793 = vsyncpa [#allocation4 + $0x1], 1 }
 0x2bd   :  { %794 = vsyncpa [#allocation7], 1 }
 0x2be   :  { %796 = vsyncpa [#allocation7 + $0x1], 1 }
 0x2bf   :  { %797 = vsyncpa [#allocation10], 1 }
 0x2c0   :  { %799 = vsyncpa [#allocation10 + $0x1], 1 }
 0x2c1   :  { %800 = vsyncpa [#allocation5], 1 }
 0x2c2   :  { %802 = vsyncpa [#allocation5 + $0x1], 1 }

</bundles_post_ra>
